<compile_context>
chip_gen: v6e
topology: v6e:2x2x1
jax: 0.10.0
libtpu: 0.0.40
codegen_flags: <defaults>
</compile_context>

<pallas_src>
import jax
import jax.numpy as jnp
from jax.experimental import pallas as pl
from jax.experimental.pallas import tpu as pltpu


def _softmax_attention_kernel(e_ref, w_ref, b_ref, q_ref, s_ref, out_ref):
    """One tile of rows, everything fused into three MXU matmuls.

    e_ref  : (tn, K*D)  embeddings, feature-concatenated per row
    w_ref  : (K*D, K*D) block-diagonal weights (block i = W_i.T)
    b_ref  : (1, K*D)   concatenated biases
    q_ref  : (K*D, K*D) block-diagonal "wide query" (block i = q[:,None]*1[None,:])
    s_ref  : (K*D, D)   block-sum selection matrix (stack of K identity blocks)
    out_ref: (tn, D)    softmax-weighted sum over the K samplers
    """
    D = out_ref.shape[-1]
    e = e_ref[...]                                                 # (tn, K*D)

    # h[:, i*D:(i+1)*D] = tanh(e_i @ W_i.T + b_i)   -- one matmul, one tanh.
    h = jnp.tanh(
        jnp.dot(e, w_ref[...], preferred_element_type=jnp.float32)
        + b_ref[...]
    )

    # scores[:, i*D + d] = score_i for every d (replicated across each group),
    # so all softmax elementwise work runs at 96/128 lane occupancy.
    scores = jnp.dot(h, q_ref[...], preferred_element_type=jnp.float32)

    m = jnp.max(scores, axis=-1, keepdims=True)                    # (tn, 1)
    exps = jnp.exp(scores - m)                                     # (tn, K*D)
    # each distinct exp is replicated D times -> true denom = lane_sum / D
    denom = jnp.sum(exps, axis=-1, keepdims=True) * (1.0 / D)      # (tn, 1)

    # EUP approx reciprocal (free slot) + one Newton step -> ~f32 accuracy.
    inv = pl.reciprocal(denom, approx=True)
    inv = inv * (2.0 - denom * inv)                                # (tn, 1)

    # raw[:, d] = sum_i exp_i * e_i[:, d]   (one (tn,96)@(96,32) matmul)
    raw = jnp.dot(exps * e, s_ref[...], preferred_element_type=jnp.float32)
    out_ref[...] = (raw * inv).astype(out_ref.dtype)


def _round_up(x, m):
    return ((x + m - 1) // m) * m


def _select_tile(n, max_tile_n, min_grid=2):
    """Tile rows (multiple of 8) aiming for >= min_grid grid steps (v7x has
    two TensorCores sharded over the parallel grid axis), then rebalance the
    tile so row padding is minimal."""
    tile = max(8, min(max_tile_n, _round_up(pl.cdiv(n, min_grid), 8)))
    grid_n = pl.cdiv(n, tile)
    tile = _round_up(pl.cdiv(n, grid_n), 8)      # rebalance, keeps same grid_n
    return tile, grid_n, tile * grid_n


def softmax_attention(embeds_stacked, weights, biases, query_w, *,
                      max_tile_n=4096):
    """embeds_stacked: (K, N, D); weights: (K, D, D) torch (out, in) layout;
    biases: (K, D); query_w: (1, D).  Returns (N, D)."""
    K, N, D = embeds_stacked.shape
    KD = K * D
    dtype = embeds_stacked.dtype

    # ---- wrapper-side layout plumbing (pure XLA, tiny constants) ----------
    # feature-concatenated embeddings: row n = [e_0[n], e_1[n], ..., e_{K-1}[n]]
    e_cat = jnp.transpose(embeds_stacked, (1, 0, 2)).reshape(N, KD)

    # block-diagonal weight (block i = W_i.T so e_cat @ W_blk == per-sampler
    # e_i @ W_i.T, never materializing K separate transposed copies per tile)
    w_blk = jnp.zeros((KD, KD), dtype)
    q_vec = query_w.reshape(D).astype(dtype)
    q_block = q_vec[:, None] * jnp.ones((1, D), dtype)       # (D, D), cols equal
    q_blk = jnp.zeros((KD, KD), dtype)
    for i in range(K):
        sl = slice(i * D, (i + 1) * D)
        w_blk = w_blk.at[sl, sl].set(weights[i].T.astype(dtype))
        q_blk = q_blk.at[sl, sl].set(q_block)
    b_cat = biases.reshape(1, KD).astype(dtype)
    s_sum = jnp.tile(jnp.eye(D, dtype=dtype), (K, 1))         # (K*D, D)

    # ---- tiling / padding --------------------------------------------------
    tile_n, grid_n, n_pad = _select_tile(N, max_tile_n)
    if n_pad != N:
        # zero rows are harmless: tanh(b) -> finite scores -> positive denom,
        # and exp*0 embeddings give exactly zero output; sliced off below.
        e_cat = jnp.pad(e_cat, ((0, n_pad - N), (0, 0)))

    # VMEM budget: double-buffered emb tile + output tile + constants, with
    # headroom; clamped to [16 MiB, 64 MiB] so it is valid on v5e/v6e/v7x.
    itemsize = jnp.dtype(dtype).itemsize
    need = 2 * itemsize * (tile_n * KD + tile_n * D + 2 * KD * KD + KD + KD * D)
    vmem_limit = int(min(64 << 20, max(need + (4 << 20), 16 << 20)))

    out = pl.pallas_call(
        _softmax_attention_kernel,
        out_shape=jax.ShapeDtypeStruct((n_pad, D), dtype),
        grid=(grid_n,),
        in_specs=[
            pl.BlockSpec((tile_n, KD), lambda n: (n, 0)),
            # grid-invariant operands: constant index_maps -> DMA'd once
            pl.BlockSpec((KD, KD), lambda n: (0, 0)),
            pl.BlockSpec((1, KD), lambda n: (0, 0)),
            pl.BlockSpec((KD, KD), lambda n: (0, 0)),
            pl.BlockSpec((KD, D), lambda n: (0, 0)),
        ],
        out_specs=pl.BlockSpec((tile_n, D), lambda n: (n, 0)),
        compiler_params=pltpu.CompilerParams(
            dimension_semantics=("parallel",),
            vmem_limit_bytes=vmem_limit,
        ),
    )(e_cat, w_blk, b_cat, q_blk, s_sum)

    return out[:N] if n_pad != N else out


def softmax_attention_ref(embeds_stacked, weights, biases, query_w):
    """Pure-JAX reference mirroring the PyTorch forward."""
    K = embeds_stacked.shape[0]
    xs = [jnp.tanh(embeds_stacked[i] @ weights[i].T + biases[i]) for i in range(K)]
    scores = jnp.concatenate([x @ query_w.T for x in xs], axis=1)      # (N, K)
    w = jax.nn.softmax(scores, axis=1)                                 # (N, K)
    emb = jnp.stack([embeds_stacked[i] for i in range(K)], axis=1)     # (N, K, D)
    return jnp.sum(w[..., None] * emb, axis=1)                         # (N, D)


def _make_inputs(key, samplers, n_rows, feat_dim):
    k_emb, k_w, k_b, k_q = jax.random.split(key, 4)
    embeds = jax.random.normal(k_emb, (samplers, n_rows, feat_dim), jnp.float32)
    lin_w = 0.1 * jax.random.normal(k_w, (samplers, feat_dim, feat_dim), jnp.float32)
    lin_b = 0.1 * jax.random.normal(k_b, (samplers, feat_dim), jnp.float32)
    query_w = 0.1 * jax.random.normal(k_q, (1, feat_dim), jnp.float32)
    return embeds, lin_w, lin_b, query_w


if __name__ == "__main__":
    feat_dim = 32      # D
    samplers = 3       # K

    # small shape (matches the toy module usage)
    embeds, lin_w, lin_b, query_w = _make_inputs(
        jax.random.PRNGKey(0), samplers, 16, feat_dim)
    out = jax.block_until_ready(softmax_attention(embeds, lin_w, lin_b, query_w))
    ref = softmax_attention_ref(embeds, lin_w, lin_b, query_w)
    assert out.shape == (16, feat_dim)
    assert jnp.allclose(out, ref, atol=1e-4, rtol=1e-4), "mismatch (small shape)"

    # larger shape (multi-step grid) and an awkward row count (exercises the
    # cdiv + zero-padding tail path; no divisibility assert any more)
    for n_rows, seed in ((2048, 1), (1000, 2)):
        e2, w2, b2, q2 = _make_inputs(jax.random.PRNGKey(seed),
                                      samplers, n_rows, feat_dim)
        o2 = jax.block_until_ready(softmax_attention(e2, w2, b2, q2))
        r2 = softmax_attention_ref(e2, w2, b2, q2)
        assert o2.shape == (n_rows, feat_dim)
        assert jnp.allclose(o2, r2, atol=1e-4, rtol=1e-4), f"mismatch (N={n_rows})"

    print("KERNEL_OK")
</pallas_src>

<mosaic_0001>
module attributes {stable_mosaic.version = 11 : i64} {
  func.func @_softmax_attention_kernel(%arg0: i32, %arg1: memref<8x96xf32, #tpu.memory_space<vmem>>, %arg2: memref<96x96xf32, #tpu.memory_space<vmem>>, %arg3: memref<1x96xf32, #tpu.memory_space<vmem>>, %arg4: memref<96x96xf32, #tpu.memory_space<vmem>>, %arg5: memref<96x32xf32, #tpu.memory_space<vmem>>, %arg6: memref<8x32xf32, #tpu.memory_space<vmem>>) attributes {dimension_semantics = [#tpu.dimension_semantics<parallel>], iteration_bounds = array<i64: 2>, scalar_prefetch = 0 : i64, scratch_operands = 0 : i64, tpu.core_type = #tpu.core_type<tc>, window_params = [{transform_indices = @transform_0, window_bounds = array<i64: 8, 96>}, {pipeline_mode = #tpu.pipeline_mode<synchronous>, transform_indices = @transform_1, window_bounds = array<i64: 96, 96>}, {pipeline_mode = #tpu.pipeline_mode<synchronous>, transform_indices = @transform_2, window_bounds = array<i64: 1, 96>}, {pipeline_mode = #tpu.pipeline_mode<synchronous>, transform_indices = @transform_3, window_bounds = array<i64: 96, 96>}, {pipeline_mode = #tpu.pipeline_mode<synchronous>, transform_indices = @transform_4, window_bounds = array<i64: 96, 32>}, {transform_indices = @transform_5, window_bounds = array<i64: 8, 32>}]} {
    %c0 = arith.constant 0 : index
    %c0_0 = arith.constant 0 : index
    %0 = vector.load %arg1[%c0, %c0_0] : memref<8x96xf32, #tpu.memory_space<vmem>>, vector<8x96xf32>
    %c0_1 = arith.constant 0 : index
    %c0_2 = arith.constant 0 : index
    %1 = vector.load %arg2[%c0_1, %c0_2] : memref<96x96xf32, #tpu.memory_space<vmem>>, vector<96x96xf32>
    %cst = arith.constant dense<0.000000e+00> : vector<8x96xf32>
    %2 = tpu.matmul %0, %1, %cst {dimension_numbers = #tpu.dot_dimension_numbers<[1], [0], [0], [1], [0, 0, 1, 1], [], []>} : vector<8x96xf32>, vector<96x96xf32>, vector<8x96xf32> -> vector<8x96xf32>
    %c0_3 = arith.constant 0 : index
    %c0_4 = arith.constant 0 : index
    %3 = vector.load %arg3[%c0_3, %c0_4] : memref<1x96xf32, #tpu.memory_space<vmem>>, vector<1x96xf32>
    %4 = vector.broadcast %3 : vector<1x96xf32> to vector<8x96xf32>
    %5 = arith.addf %2, %4 : vector<8x96xf32>
    %6 = math.tanh %5 : vector<8x96xf32>
    %c0_5 = arith.constant 0 : index
    %c0_6 = arith.constant 0 : index
    %7 = vector.load %arg4[%c0_5, %c0_6] : memref<96x96xf32, #tpu.memory_space<vmem>>, vector<96x96xf32>
    %cst_7 = arith.constant dense<0.000000e+00> : vector<8x96xf32>
    %8 = tpu.matmul %6, %7, %cst_7 {dimension_numbers = #tpu.dot_dimension_numbers<[1], [0], [0], [1], [0, 0, 1, 1], [], []>} : vector<8x96xf32>, vector<96x96xf32>, vector<8x96xf32> -> vector<8x96xf32>
    %cst_8 = arith.constant dense<0xFF800000> : vector<8xf32>
    %9 = vector.multi_reduction <maximumf>, %8, %cst_8 [1] : vector<8x96xf32> to vector<8xf32>
    %10 = vector.shape_cast %9 : vector<8xf32> to vector<8x1xf32>
    %11 = vector.broadcast %10 : vector<8x1xf32> to vector<8x96xf32>
    %12 = arith.subf %8, %11 : vector<8x96xf32>
    %13 = math.exp %12 : vector<8x96xf32>
    %cst_9 = arith.constant dense<0.000000e+00> : vector<8xf32>
    %14 = vector.multi_reduction <add>, %13, %cst_9 [1] : vector<8x96xf32> to vector<8xf32>
    %15 = vector.shape_cast %14 : vector<8xf32> to vector<8x1xf32>
    %cst_10 = arith.constant 3.125000e-02 : f32
    %16 = vector.broadcast %cst_10 : f32 to vector<8x1xf32>
    %17 = arith.mulf %15, %16 : vector<8x1xf32>
    %18 = tpu.reciprocal %17 {approx = true} : vector<8x1xf32> -> vector<8x1xf32>
    %19 = arith.mulf %17, %18 : vector<8x1xf32>
    %cst_11 = arith.constant 2.000000e+00 : f32
    %20 = vector.broadcast %cst_11 : f32 to vector<8x1xf32>
    %21 = arith.subf %20, %19 : vector<8x1xf32>
    %22 = arith.mulf %18, %21 : vector<8x1xf32>
    %23 = arith.mulf %13, %0 : vector<8x96xf32>
    %c0_12 = arith.constant 0 : index
    %c0_13 = arith.constant 0 : index
    %24 = vector.load %arg5[%c0_12, %c0_13] : memref<96x32xf32, #tpu.memory_space<vmem>>, vector<96x32xf32>
    %cst_14 = arith.constant dense<0.000000e+00> : vector<8x32xf32>
    %25 = tpu.matmul %23, %24, %cst_14 {dimension_numbers = #tpu.dot_dimension_numbers<[1], [0], [0], [1], [0, 0, 1, 1], [], []>} : vector<8x96xf32>, vector<96x32xf32>, vector<8x32xf32> -> vector<8x32xf32>
    %26 = vector.broadcast %22 : vector<8x1xf32> to vector<8x32xf32>
    %27 = arith.mulf %25, %26 : vector<8x32xf32>
    %c0_15 = arith.constant 0 : index
    %c0_16 = arith.constant 0 : index
    %28 = vector.load %arg6[%c0_15, %c0_16] : memref<8x32xf32, #tpu.memory_space<vmem>>, vector<8x32xf32>
    tpu.vector_store %arg6[%c0_15, %c0_16], %27 {strides = array<i32>} : memref<8x32xf32, #tpu.memory_space<vmem>>, vector<8x32xf32>,
    return
  }
  func.func @transform_0(%arg0: i32) -> (i32, i32) {
    %c0_i32 = arith.constant 0 : i32
    %c0_i32_0 = arith.constant 0 : i32
    return %arg0, %c0_i32 : i32, i32
  }
  func.func @transform_1(%arg0: i32) -> (i32, i32) {
    %c0_i32 = arith.constant 0 : i32
    %c0_i32_0 = arith.constant 0 : i32
    %c0_i32_1 = arith.constant 0 : i32
    return %c0_i32, %c0_i32_0 : i32, i32
  }
  func.func @transform_2(%arg0: i32) -> (i32, i32) {
    %c0_i32 = arith.constant 0 : i32
    %c0_i32_0 = arith.constant 0 : i32
    %c0_i32_1 = arith.constant 0 : i32
    return %c0_i32, %c0_i32_0 : i32, i32
  }
  func.func @transform_3(%arg0: i32) -> (i32, i32) {
    %c0_i32 = arith.constant 0 : i32
    %c0_i32_0 = arith.constant 0 : i32
    %c0_i32_1 = arith.constant 0 : i32
    return %c0_i32, %c0_i32_0 : i32, i32
  }
  func.func @transform_4(%arg0: i32) -> (i32, i32) {
    %c0_i32 = arith.constant 0 : i32
    %c0_i32_0 = arith.constant 0 : i32
    %c0_i32_1 = arith.constant 0 : i32
    return %c0_i32, %c0_i32_0 : i32, i32
  }
  func.func @transform_5(%arg0: i32) -> (i32, i32) {
    %c0_i32 = arith.constant 0 : i32
    %c0_i32_0 = arith.constant 0 : i32
    return %arg0, %c0_i32 : i32, i32
  }
}

</mosaic_0001>

<bundles_post_ra>
// kernel: tpu_custom_call.1
= control target key start
LH: loop header
LB: loop body
LE: loop exit
PB: predicated region body
PF: predicated region fallthrough
CT: control target
= control target key end

     0   :  { %10 = vsyncpa [#allocation3], 0  ;;  %s1164_s0 = inlined_call_operand.vmem [shape: f32[16,96], index: 0, kind: input, shape index: {}]   ;;  %s1165_s1 = inlined_call_operand.vmem [shape: f32[96,96], index: 1, kind: input, shape index: {}]   ;;  %s1166_s2 = inlined_call_operand.vmem [shape: f32[1,96], index: 2, kind: input, shape index: {}]   ;;  %s1167_s3 = inlined_call_operand.hbm [shape: f32[96,96], index: 3, kind: input, shape index: {}]   ;;  %s1168_s4 = inlined_call_operand.vmem [shape: f32[96,32], index: 4, kind: input, shape index: {}]   ;;  %s1169_s5 = inlined_call_operand.hbm [shape: f32[16,32], index: 5, kind: output, shape index: {}]  }
   0x1   :  { %11 = vsyncpa [#allocation4], 0 }
   0x2   :  { %13 = vsyncpa [#allocation4 + $0x1], 0  ;;  %s927_s18 = smov 0   ;;  %s929_s19 = smov 0  }
   0x3   :  { %s931_s20 = smov 0   ;;  %s933_s21 = smov 0  }
   0x4 LB: > { %s948_s22 = sadd.s32 4294967295, %s889_s21   ;;  %s603_s23 = sadd.s32 4294967294, %s889_s21   ;;  %s889_s21 = sphi %s933_s21, %s1177_s21   ;;  %s885_s20 = sphi %s931_s20, %s1176_s20   ;;  %s881_s19 = sphi %s929_s19, %s1175_s19   ;;  %s877_s18 = sphi %s927_s18, %s1174_s18  }
   0x5   : > { %s952_s24 = sadd.s32 1, %s889_s21   ;;  %s136_s25 = sadd.s32 1, %s885_s20 }
   0x6   : > { %s133_s26 = ssub.s32 %s889_s21, %s952_s24  ;;  %p146_p0 = scmp.ne.s32.totalorder %s885_s20, %s881_s19 }
   0x7   : > { %p134_p1 = scmp.eq.s32.totalorder %s133_s26, 0  ;;  %p147_p2 = scmp.eq.s32.totalorder %s948_s22, 1 }
   0x8   : > { %p152_p3 = scmp.ne.s32.totalorder %s881_s19, %s877_s18  ;;  %p153_p4 = scmp.eq.s32.totalorder %s603_s23, 1 }
   0x9   : > { %s963_s27 = scalar_select %p134_p1, %s885_s20, %s136_s25  }
   0xa   : > { %p965_p5 = por %p147_p2, %p146_p0  ;;  %p969_p6 = por %p153_p4, %p152_p3 }
   0xb   : > { %p604_p7 = scmp.ge.s32.totalorder %s889_s21, 1  ;;  %p160_p8 = scmp.lt.s32.totalorder %s889_s21, 3 }
   0xc   : > { %s1171_s29 = scalar_select %p969_p6, 1, 0 }
   0xd   : > { %p753_p9 = scmp.eq.s32.totalorder %s948_s22, 0  ;;  %p976_p10 = pnand %p604_p7, %p160_p8 }
   0xe   : > { %s891_s6 = smov [#allocation2]  }
   0xf   : > { %s178_s7 = sshll.u32 %s891_s6, 4  ;;  %p745_p11 = pneg %p976_p10  ;;  %s179_s7 = int_to_ptr.vmem [resolvable:$true] %s178_s7 }
  0x10   : > { %s810_s8 = scalar_lea.vmem %s179_s7, 1536  ;;  %p818_p3 = scmp.lt.s32.totalorder %s179_s7, %s179_s7 }
  0x11   : > { %p746_p12 = pnand %p753_p9, %p745_p11  ;;  %p811_p0 = scmp.ne.s32.totalorder %s179_s7, %s810_s8 }
  0x12   : > { %p819_p4 = scmp.lt.s32.totalorder %s810_s8, %s810_s8 }
  0x13   : > { %p801_p13 = pneg %p746_p12 }
  0x14   : > { %p820_p6 = por %p819_p4, %p818_p3 }
  0x15   : > { %p813_p1 = pnand %p811_p0, %p801_p13 }
  0x17   : > { %p814_p2 = pneg %p813_p1 }
  0x19   : > { %p821_p7 = pnand %p820_p6, %p814_p2 }
  0x1b   : > { %824 = shalt.err (!%p821_p7)
}
  0x1c   : > { %s892_s9 = smov 128   ;;  %s893_s10 = smov 8  }
  0x1d   : > { %748 = dma.hbm_to_vmem [thread:$0]  (!%p746_p12), %s1167_s3, 1536, %s179_s7, [#allocation3], %s892_s9, %s892_s9, %s893_s10  }
  0x1e   : > { %204 = sbr.rel (%p976_p10) target bundleno = 831 (0x33f), region = 40 }
  0x23   : > { %868 = dma.done.wait (%p753_p9), [#allocation3], 1536  }
  0x24   : > { %870 = vsyncadd (%p753_p9), [#allocation3], 4294965760  ;;  %v894_v0 = vmov 0.0   ;;  %vm895_vm0 = vmmov 0   ;;  %v247_v1 = vld [vmem:[%s1165_s1 + $0x58] sm:$0xff]  ;;  %v246_v2 = vld [vmem:[%s1165_s1 + $0x50] sm:$0xff] }
  0x25   : > { %658 = vmatprep.subr.mxu0 %v894_v0  ;;  %682 = vmatprep.mubr.msk.f32.mxu0 %vm895_vm0, %v894_v0  ;;  %v245_v3 = vld [vmem:[%s1165_s1 + $0x48] sm:$0xff]  ;;  %v244_v4 = vld [vmem:[%s1165_s1 + $0x40] sm:$0xff]  ;;  %v341_v5 = vld [vmem:[#allocation2 + $0x58] sm:$0xff]  ;;  %p231_p6 = scmp.lt.s32.totalorder %s948_s22, 1  ;;  %vm255_vm1 = vcmask 785408   ;;  %s228_s26 = sand.u32 1, %s881_s19  }
  0x26   : > { %685 = vmatprep.subr.mxu1 %v894_v0  ;;  %709 = vmatprep.mubr.msk.f32.mxu1 %vm895_vm0, %v894_v0  ;;  %v340_v6 = vld [vmem:[#allocation2 + $0x50] sm:$0xff]  ;;  %v243_v7 = vld [vmem:[%s1165_s1 + $0x38] sm:$0xff]  ;;  %v339_v8 = vld [vmem:[#allocation2 + $0x48] sm:$0xff]  ;;  %s609_s30 = sshll.u32 %s228_s26, 3  ;;  %s616_s6 = sshll.u32 %s948_s22, 7  ;;  %vm516_vm2 = vcmask 261120  }
  0x27   : > { %659 = vmatpush3.msra.mxu0 %v247_v1  ;;  %686 = vmatpush3.msra.mxu1 %v341_v5  ;;  %v242_v9 = vld [vmem:[%s1165_s1 + $0x30] sm:$0xff]  ;;  %v241_v10 = vld [vmem:[%s1165_s1 + $0x28] sm:$0xff]  ;;  %s232_s11 = scalar_select %p231_p6, %s948_s22, 1  ;;  %v240_v11 = vld [vmem:[%s1165_s1 + $0x20] sm:$0xff] }
  0x28   : > { %660 = vmatprep.subr.mxu0 %v894_v0  ;;  %687 = vmatprep.subr.mxu1 %v894_v0  ;;  %v239_v12 = vld [vmem:[%s1165_s1 + $0x18] sm:$0xff]  ;;  %v238_v13 = vld [vmem:[%s1165_s1 + $0x10] sm:$0xff]  ;;  %v237_v14 = vld [vmem:[%s1165_s1 + $0x8] sm:$0xff]  ;;  %s519_s12 = scalar_lea.sflag [#allocation4], %s228_s26  ;;  %s896_s22 = smov [#allocation5]  }
  0x29   : > { %661 = vmatpush3.msra.mxu0 %v246_v2  ;;  %688 = vmatpush3.msra.mxu1 %v340_v6  ;;  %s610_s16 = sshll.u32 %s232_s11, 3  ;;  %v236_v15 = vld [vmem:[%s1165_s1] sm:$0xff]  ;;  %v337_v18 = vld [vmem:[#allocation2 + $0x38] sm:$0xff]  ;;  %v336_v19 = vld [vmem:[#allocation2 + $0x30] sm:$0xff]  ;;  %s1129_s11 = scalar_lea.hbm %s1169_s5, %s616_s6 }
  0x2a   : > { %662 = vmatprep.subr.mxu0 %v894_v0  ;;  %689 = vmatprep.subr.mxu1 %v894_v0  ;;  %s234_s7 = scalar_lea.vmem %s1164_s0, %s610_s16  ;;  %v338_v17 = vld [vmem:[#allocation2 + $0x40] sm:$0xff]  ;;  %v335_v20 = vld [vmem:[#allocation2 + $0x28] sm:$0xff]  ;;  %v333_v22 = vld [vmem:[#allocation2 + $0x18] sm:$0xff]  ;;  %s829_s14 = sshll.u32 %s896_s22, 4  ;;  %s830_s14 = int_to_ptr.vmem [resolvable:$false] %s829_s14 }
  0x2b   : > { %663 = vmatpush3.msra.mxu0 %v245_v3  ;;  %690 = vmatpush3.msra.mxu1 %v339_v8  ;;  %v1053_v16 = vld [vmem:[%s234_s7] sm:$0xff]  ;;  %v332_v23 = vld [vmem:[#allocation2 + $0x10] sm:$0xff]  ;;  %v331_v24 = vld [vmem:[#allocation2 + $0x8] sm:$0xff]  ;;  %s230_s7 = scalar_lea.vmem [#allocation5], %s609_s30  ;;  %s831_s15 = scalar_lea.vmem %s830_s14, 256 }
  0x2c   : > { %664 = vmatprep.subr.mxu0 %v894_v0  ;;  %691 = vmatprep.subr.mxu1 %v894_v0  ;;  %v334_v21 = vld [vmem:[#allocation2 + $0x20] sm:$0xff]  ;;  %v441_v31 = vld [vmem:[%s1168_s4 + $0x58] sm:$0xff]  ;;  %v440_v32 = vld [vmem:[%s1168_s4 + $0x50] sm:$0xff]  ;;  %s532_s8 = sshll.u32 %s230_s7, 4  ;;  %s533_s8 = int_to_ptr.vmem [resolvable:$true] %s532_s8 }
  0x2d   : > { %665 = vmatpush3.msra.mxu0 %v244_v4  ;;  %692 = vmatpush3.msra.mxu1 %v338_v17  ;;  %v330_v25 = vld [vmem:[#allocation2] sm:$0xff]  ;;  %v439_v36 = vld [vmem:[%s1168_s4 + $0x48] sm:$0xff]  ;;  %v437_v38 = vld [vmem:[%s1168_s4 + $0x38] sm:$0xff]  ;;  %s825_s13 = scalar_lea.vmem %s533_s8, 128  ;;  %p832_p11 = scmp.lt.s32.totalorder %s533_s8, %s830_s14 }
  0x2e   : > { %666 = vmatprep.subr.mxu0 %v894_v0  ;;  %693 = vmatprep.subr.mxu1 %v894_v0  ;;  %v611_v26 = vld [vmem:[%s1166_s2] ss:$0 sm:$0xff]  ;;  %v436_v39 = vld [vmem:[%s1168_s4 + $0x30] sm:$0xff]  ;;  %v435_v40 = vld [vmem:[%s1168_s4 + $0x28] sm:$0xff]  ;;  %p826_p8 = scmp.ne.s32.totalorder %s533_s8, %s825_s13  ;;  %p833_p12 = scmp.lt.s32.totalorder %s831_s15, %s825_s13 }
  0x2f   : > { %667 = vmatpush3.msra.mxu0 %v243_v7  ;;  %694 = vmatpush3.msra.mxu1 %v337_v18  ;;  %v438_v37 = vld [vmem:[%s1168_s4 + $0x40] sm:$0xff]  ;;  %v433_v42 = vld [vmem:[%s1168_s4 + $0x18] sm:$0xff]  ;;  %v432_v43 = vld [vmem:[%s1168_s4 + $0x10] sm:$0xff] }
  0x30   : > { %668 = vmatprep.subr.mxu0 %v894_v0  ;;  %695 = vmatprep.subr.mxu1 %v894_v0  ;;  %v434_v41 = vld [vmem:[%s1168_s4 + $0x20] sm:$0xff]  ;;  %v431_v44 = vld [vmem:[%s1168_s4 + $0x8] sm:$0xff]  ;;  %p827_p9 = pnand %p826_p8, %p965_p5  ;;  %p834_p13 = por %p833_p12, %p832_p11 }
  0x31   : > { %669 = vmatpush3.msra.mxu0 %v242_v9  ;;  %696 = vmatpush3.msra.mxu1 %v336_v19  ;;  %v430_v45 = vld [vmem:[%s1168_s4] sm:$0xff] }
  0x32   : > { %670 = vmatprep.subr.mxu0 %v894_v0  ;;  %697 = vmatprep.subr.mxu1 %v894_v0  ;;  %p828_p10 = pneg %p827_p9 }
  0x33   : > { %671 = vmatpush3.msra.mxu0 %v241_v10  ;;  %698 = vmatpush3.msra.mxu1 %v335_v20 }
  0x34   : > { %672 = vmatprep.subr.mxu0 %v894_v0  ;;  %699 = vmatprep.subr.mxu1 %v894_v0  ;;  %p835_p0 = pnand %p834_p13, %p828_p10 }
  0x35   : > { %673 = vmatpush3.msra.mxu0 %v240_v11  ;;  %700 = vmatpush3.msra.mxu1 %v334_v21 }
  0x36   : > { %674 = vmatprep.subr.mxu0 %v894_v0  ;;  %701 = vmatprep.subr.mxu1 %v894_v0 }
  0x37   : > { %675 = vmatpush3.msra.mxu0 %v239_v12  ;;  %702 = vmatpush3.msra.mxu1 %v333_v22 }
  0x38   : > { %676 = vmatprep.subr.mxu0 %v894_v0  ;;  %703 = vmatprep.subr.mxu1 %v894_v0 }
  0x39   : > { %677 = vmatpush3.msra.mxu0 %v238_v13  ;;  %704 = vmatpush3.msra.mxu1 %v332_v23 }
  0x3a   : > { %678 = vmatprep.subr.mxu0 %v894_v0  ;;  %705 = vmatprep.subr.mxu1 %v894_v0 }
  0x3b   : > { %679 = vmatpush3.msra.mxu0 %v237_v14  ;;  %706 = vmatpush3.msra.mxu1 %v331_v24 }
  0x3c   : > { %680 = vmatprep.subr.mxu0 %v894_v0  ;;  %707 = vmatprep.subr.mxu1 %v894_v0 }
  0x3d   : > { %681 = vmatpush3.msra.mxu0 %v236_v15  ;;  %708 = vmatpush3.msra.mxu1 %v330_v25 }
  0x3e   : > { %683 = vmatmul.mubr.msk.f32.vlgmr.msra.gmra.mxu0 %vm255_vm1, %v1053_v16  ;;  %712 = vmatprep.subr.mxu0 %v894_v0 }
  0x3f   : > { %736 = vmatprep.mubr.msk.f32.mxu0 %vm895_vm0, %v894_v0  ;;  %713 = vmatpush3.msra.mxu0 %v441_v31 }
  0x40   : > { %714 = vmatprep.subr.mxu0 %v894_v0 }
  0x41   : > { %715 = vmatpush3.msra.mxu0 %v440_v32 }
  0x42   : > { %716 = vmatprep.subr.mxu0 %v894_v0 }
  0x43   : > { %717 = vmatpush3.msra.mxu0 %v439_v36 }
  0x44   : > { %718 = vmatprep.subr.mxu0 %v894_v0 }
  0x45   : > { %719 = vmatpush3.msra.mxu0 %v438_v37 }
  0x46   : > { %720 = vmatprep.subr.mxu0 %v894_v0 }
  0x47   : > { %721 = vmatpush3.msra.mxu0 %v437_v38 }
  0x48   : > { %722 = vmatprep.subr.mxu0 %v894_v0 }
  0x49   : > { %723 = vmatpush3.msra.mxu0 %v436_v39 }
  0x4a   : > { %724 = vmatprep.subr.mxu0 %v894_v0 }
  0x4b   : > { %725 = vmatpush3.msra.mxu0 %v435_v40 }
  0x4c   : > { %726 = vmatprep.subr.mxu0 %v894_v0 }
  0x4d   : > { %727 = vmatpush3.msra.mxu0 %v434_v41 }
  0x4e   : > { %728 = vmatprep.subr.mxu0 %v894_v0 }
  0x4f   : > { %729 = vmatpush3.msra.mxu0 %v433_v42 }
  0x50   : > { %730 = vmatprep.subr.mxu0 %v894_v0 }
  0x51   : > { %731 = vmatpush3.msra.mxu0 %v432_v43 }
  0x52   : > { %732 = vmatprep.subr.mxu0 %v894_v0 }
  0x53   : > { %733 = vmatpush3.msra.mxu0 %v431_v44 }
  0x54   : > { %734 = vmatprep.subr.mxu0 %v894_v0 }
  0x55   : > { %735 = vmatpush3.msra.mxu0 %v430_v45 }
  0xfe   : > { %v325_v27 = vpop.f32.mrf.mxu0 }
  0xff   : > { %v326_v28 = vadd.f32 %v611_v26, %v325_v27 }
 0x100   : > { %v684_v29 = vpop.f32.mrf.mxu0 }
 0x101   : > { %793 = vtanh.f32 %v326_v28 }
 0x10e   : > { %v794_v30 = vpop.eup %793 }
 0x10f   : > { %710 = vmatmul.mubr.msk.f32.vlgmr.msra.gmra.mxu1 %vm255_vm1, %v794_v30 }
 0x1cf   : > { %v411_v33 = vpop.f32.mrf.mxu1 }
 0x1d0   : > { %v415_v34 = vsel %vm255_vm1, %v411_v33, -inf }
 0x1d1   : > { %416 = vmax.xlane.f32.xlu0 %v415_v34  ;;  %v711_v35 = vpop.f32.mrf.mxu1 }
 0x25a   : > { %v417_v46 = vpop.xlane.xlu0 %416 }
 0x25b   : > { %v418_v47 = vsub.f32 %v411_v33, %v417_v46 }
 0x25d   : > { %v419_v48 = vmul.f32 1.442695, %v418_v47 }
 0x25f   : > { %795 = vpow2.f32 %v419_v48 }
 0x26c   : > { %v796_v49 = vpop.eup %795 }
 0x26d   : > { %v421_v50 = vsel %vm255_vm1, %v796_v49, 0.0  ;;  %v429_v51 = vmul.f32 %v796_v49, %v1053_v16 }
 0x26e   : > { %422 = vadd.xlane.f32.xlu0 %v421_v50 }
 0x26f   : > { %737 = vmatmul.mubr.msk.f32.vlgmr.msra.gmra.mxu0 %vm255_vm1, %v429_v51 }
 0x2f7   : > { %v423_v52 = vpop.xlane.xlu0 %422 }
 0x2f8   : > { %v424_v53 = vmul.f32 0.03125, %v423_v52 }
 0x2fa   : > { %797 = vrcp.f32 %v424_v53 }
 0x307   : > { %v798_v54 = vpop.eup %797 }
 0x308   : > { %v426_v55 = vmul.f32 %v798_v54, %v424_v53 }
 0x30a   : > { %v427_v56 = vsub.f32 2.0, %v426_v55 }
 0x30c   : > { %v428_v57 = vmul.f32 %v798_v54, %v427_v56 }
 0x32f   : > { %v511_v58 = vpop.f32.mrf.mxu0 }
 0x330   : > { %v515_v59 = vmul.f32 %v511_v58, %v428_v57 }
 0x331   : > { %v738_v60 = vpop.f32.mrf.mxu0 }
 0x332   : > { %517 = vst.msk [vmem:[%s230_s7] sm:$0xff] %vm516_vm2, %v515_v59 }
 0x333   : > { %838 = shalt.err (!%p835_p0)
}
 0x334   : > { %s839_s16 = scalar_lea.hbm %s1129_s11, 128  ;;  %s843_s25 = scalar_lea.hbm %s1169_s5, 256 }
 0x335   : > { %p840_p1 = scmp.ne.s32.totalorder %s1129_s11, %s839_s16  ;;  %p844_p4 = scmp.lt.s32.totalorder %s1129_s11, %s1169_s5 }
 0x336   : > { %p845_p7 = scmp.lt.s32.totalorder %s843_s25, %s839_s16 }
 0x337   : > { %p841_p2 = pnand %p840_p1, %p965_p5 }
 0x338   : > { %p846_p6 = por %p845_p7, %p844_p4 }
 0x339   : > { %p842_p3 = pneg %p841_p2 }
 0x33b   : > { %p847_p8 = pnand %p846_p6, %p842_p3 }
 0x33d   : > { %850 = shalt.err (!%p847_p8)
}
 0x33e   : > { %743 = dma.vmem_to_hbm [thread:$0]  (%p965_p5), %s533_s8, 128, %s1129_s11, %s519_s12  }
 0x33f PF: > { %p755_p9 = scmp.ge.s32.totalorder %s889_s21, 2  ;;  %s544_s6 = sand.u32 1, %s877_s18  }
 0x340   : > { %p1173_p10 = scmp.ne.s32.totalorder %s1171_s29, 0  ;;  %s545_s7 = scalar_lea.sflag [#allocation4], %s544_s6 }
 0x342   : > { %p750_p11 = pnand %p755_p9, %p1173_p10 }
 0x344   : > { %p751_p12 = pneg %p750_p11 }
 0x346   : > { %872 = dma.done.wait (%p751_p12), %s545_s7, 128  }
 0x347   : > { %874 = vsyncadd (%p751_p12), %s545_s7, 4294967168  ;;  %p16_p13 = scmp.ge.s32.totalorder %s952_s24, 4   ;;  %s1174_s18 = smov %s881_s19 }
 0x348   : > { %s1175_s19 = smov %s885_s20  ;;  %s1176_s20 = smov %s963_s27 }
 0x349   : > { %s1177_s21 = smov %s952_s24  ;;  %18 = sbr.rel (!%p16_p13) target bundleno = 4 (0x4), region = 80 }
 0x34e   :  { %550 = vsyncpa [#allocation3], 1 }
 0x34f   :  { %552 = vsyncpa [#allocation3 + $0x1], 1 }
 0x350   :  { %553 = vsyncpa [#allocation4], 1 }
 0x351   :  { %555 = vsyncpa [#allocation4 + $0x1], 1 }

</bundles_post_ra>
